<compile_context>
chip_gen: v7x
topology: tpu7x:2x2x1
jax: 0.10.0
libtpu: 0.0.40
codegen_flags: <defaults>
</compile_context>

<pallas_src>
import functools

import jax
import jax.numpy as jnp
from jax import lax
from jax.experimental import pallas as pl
from jax.experimental.pallas import tpu as pltpu


def fire_kernel(x_ref, wsq_ref, wex_ref, b_ref, out_ref, im2col_ref,
                *, H, W, G):
    """G images per grid step; channels on sublanes, flat spatial on lanes.

    x_ref      : (G, Cin, H*W)        f32  input images
    wsq_ref    : (Csq, Cin)           bf16 squeeze 1x1 weights
    wex_ref    : (Cout, 9*Csq)        bf16 fused expand weights
                                      (rows [0,Ce1) only use the centre tap)
    b_ref      : (Csq + Cout, 1)      f32  [bsq ; be1 ; be3]
    out_ref    : (G, Cout, H*W)       f32  output, channels = [e1 | e3]
    im2col_ref : (9*Csq, H*W)         f32  scratch, row = tap*Csq + ci
    """
    HW = H * W
    Csq = wsq_ref.shape[0]
    Cout = out_ref.shape[1]

    bsq = b_ref[pl.ds(0, Csq), :]                       # (Csq, 1)
    bex = b_ref[pl.ds(Csq, Cout), :]                    # (Cout, 1)

    # Boundary masks, hoisted: one (1, HW) iota shared by every image/tap.
    lane = lax.broadcasted_iota(jnp.int32, (1, HW), 1)
    col = lane % W
    keep_l = col >= 1           # tap reads x-1: mask column 0
    keep_r = col <= W - 2       # tap reads x+1: mask column W-1
    keep_t = lane >= W          # tap reads y-1: mask row 0
    keep_b = lane < HW - W      # tap reads y+1: mask row H-1

    def tap_mask(ky, kx):
        keep = None
        if ky == 0:
            keep = keep_t
        elif ky == 2:
            keep = keep_b
        if kx == 0:
            keep = keep_l if keep is None else jnp.logical_and(keep, keep_l)
        elif kx == 2:
            keep = keep_r if keep is None else jnp.logical_and(keep, keep_r)
        return keep

    masks = [tap_mask(ky, kx) for ky in range(3) for kx in range(3)]

    def one_image(g, carry):
        # Squeeze 1x1 + ReLU: one MXU matmul, f32 accumulation.
        x = x_ref[g].astype(jnp.bfloat16)                           # (Cin, HW)
        s = jnp.dot(wsq_ref[...], x, preferred_element_type=jnp.float32)
        s = jnp.maximum(s + bsq, 0.0)                               # (Csq, HW)

        # im2col of the 9 taps (padding=1 semantics) written straight to
        # scratch.  pltpu.roll gives shifted[p] = s[(p + d) mod HW]; every
        # wrapped / out-of-image position is zeroed by the tap mask.
        for ky in range(3):
            for kx in range(3):
                tap = ky * 3 + kx
                d = (ky - 1) * W + (kx - 1)
                t = s if d == 0 else pltpu.roll(s, (-d) % HW, axis=1)
                keep = masks[tap]
                if keep is not None:
                    t = jnp.where(keep, t, 0.0)
                im2col_ref[pl.ds(tap * Csq, Csq), :] = t

        # Fused expand1x1 + expand3x3: ONE matmul, output already ordered
        # [expand1x1 | expand3x3], one bias add + ReLU, one lane-dense store.
        o = jnp.dot(wex_ref[...], im2col_ref[...].astype(jnp.bfloat16),
                    preferred_element_type=jnp.float32)             # (Cout, HW)
        out_ref[g] = jnp.maximum(o + bex, 0.0).astype(out_ref.dtype)
        return carry

    lax.fori_loop(0, G, one_image, None, unroll=True)


def _images_per_step(n):
    """Images per grid step: amortize per-step overhead, keep grid % 2 == 0
    where possible so v7x's two TensorCores can split the batch."""
    for g in (8, 4, 2):
        if n % (2 * g) == 0:
            return g
    for g in (8, 4, 2):
        if n % g == 0:
            return g
    return 1


@jax.jit
def fire_forward(x_nchw, wsq_oihw, bsq, we1_oihw, be1, we3_oihw, be3):
    """Fire forward. x_nchw: (N, Cin, H, W) like PyTorch. Returns NCHW f32."""
    N, Cin, H, W = x_nchw.shape
    Csq = wsq_oihw.shape[0]
    Ce1 = we1_oihw.shape[0]
    Ce3 = we3_oihw.shape[0]
    Cout = Ce1 + Ce3
    HW = H * W

    G = _images_per_step(N)
    assert N % G == 0

    # NCHW-native: only a free reshape on the image (no HBM transpose, no
    # standalone dtype-convert pass -- the kernel casts to bf16 on the VPU).
    x2 = x_nchw.reshape(N, Cin, HW)

    # Weights (tiny, reused every step) are prepared / cast in the wrapper.
    wsq = wsq_oihw[:, :, 0, 0].astype(jnp.bfloat16)                 # (Csq, Cin)
    we1f = we1_oihw[:, :, 0, 0]                                     # (Ce1, Csq)
    # (Ce3, Csq, 3, 3) -> (Ce3, 3, 3, Csq) -> (Ce3, 9*Csq); col=(ky*3+kx)*Csq+ci
    we3f = jnp.transpose(we3_oihw, (0, 2, 3, 1)).reshape(Ce3, 9 * Csq)
    # Fused expand weight: expand1x1 rows live only in the centre-tap block.
    top = jnp.zeros((Ce1, 9 * Csq), we1f.dtype)
    top = top.at[:, 4 * Csq:5 * Csq].set(we1f)
    wex = jnp.concatenate([top, we3f], axis=0).astype(jnp.bfloat16)  # (Cout, 9Csq)
    # Single fused bias operand: [bsq ; be1 ; be3].
    b_all = jnp.concatenate([bsq, be1, be3]).reshape(Csq + Cout, 1)
    b_all = b_all.astype(jnp.float32)

    kernel = functools.partial(fire_kernel, H=H, W=W, G=G)

    out = pl.pallas_call(
        kernel,
        out_shape=jax.ShapeDtypeStruct((N, Cout, HW), jnp.float32),
        grid_spec=pltpu.PrefetchScalarGridSpec(
            num_scalar_prefetch=0,
            grid=(N // G,),
            in_specs=[
                pl.BlockSpec((G, Cin, HW), lambda n: (n, 0, 0)),
                pl.BlockSpec((Csq, Cin), lambda n: (0, 0)),
                pl.BlockSpec((Cout, 9 * Csq), lambda n: (0, 0)),
                pl.BlockSpec((Csq + Cout, 1), lambda n: (0, 0)),
            ],
            out_specs=pl.BlockSpec((G, Cout, HW), lambda n: (n, 0, 0)),
            scratch_shapes=[pltpu.VMEM((9 * Csq, HW), jnp.float32)],
        ),
        compiler_params=pltpu.CompilerParams(
            dimension_semantics=("parallel",)),
    )(x2, wsq, wex, b_all)

    return out.reshape(N, Cout, H, W)                               # NCHW


def fire_reference(x_nchw, wsq_oihw, bsq, we1_oihw, be1, we3_oihw, be3):
    """Pure-JAX f32 reference matching torch semantics (NCHW, OIHW weights)."""
    dn = ("NCHW", "OIHW", "NCHW")
    s = lax.conv_general_dilated(x_nchw, wsq_oihw, (1, 1), "VALID",
                                 dimension_numbers=dn)
    s = jnp.maximum(s + bsq[None, :, None, None], 0.0)
    e1 = lax.conv_general_dilated(s, we1_oihw, (1, 1), "VALID",
                                  dimension_numbers=dn)
    e1 = jnp.maximum(e1 + be1[None, :, None, None], 0.0)
    e3 = lax.conv_general_dilated(s, we3_oihw, (1, 1), ((1, 1), (1, 1)),
                                  dimension_numbers=dn)
    e3 = jnp.maximum(e3 + be3[None, :, None, None], 0.0)
    return jnp.concatenate([e1, e3], axis=1)


if __name__ == "__main__":
    # Small shapes consistent with Fire(inplanes=4, squeeze=8, e1=8, e3=8).
    N, Cin, H, W = 4, 4, 16, 16
    Csq, Ce1, Ce3 = 8, 8, 8

    key = jax.random.PRNGKey(0)
    ks = jax.random.split(key, 7)
    x = jax.random.normal(ks[0], (N, Cin, H, W), jnp.float32)

    # Deterministic parameter init (roughly PyTorch's fan_in scaling).
    wsq = jax.random.uniform(ks[1], (Csq, Cin, 1, 1), jnp.float32,
                             -1.0, 1.0) / (Cin ** 0.5)
    bsq = jax.random.uniform(ks[2], (Csq,), jnp.float32, -0.1, 0.1)
    we1 = jax.random.uniform(ks[3], (Ce1, Csq, 1, 1), jnp.float32,
                             -1.0, 1.0) / (Csq ** 0.5)
    be1 = jax.random.uniform(ks[4], (Ce1,), jnp.float32, -0.1, 0.1)
    we3 = jax.random.uniform(ks[5], (Ce3, Csq, 3, 3), jnp.float32,
                             -1.0, 1.0) / ((Csq * 9) ** 0.5)
    be3 = jax.random.uniform(ks[6], (Ce3,), jnp.float32, -0.1, 0.1)

    # Main run: N=4 -> 2 images per grid step, grid=(2,).
    out = fire_forward(x, wsq, bsq, we1, be1, we3, be3)
    out = jax.block_until_ready(out)
    ref = fire_reference(x, wsq, bsq, we1, be1, we3, be3)
    ref = jax.block_until_ready(ref)
    assert out.shape == (N, Ce1 + Ce3, H, W), out.shape
    # Tolerance loosened vs pure f32 because the MXU inputs are bf16 (f32
    # accumulation); structural bugs would show as O(0.1 - 1) errors.
    assert jnp.allclose(out, ref, rtol=5e-2, atol=5e-2), (
        float(jnp.max(jnp.abs(out - ref))))

    # Second run exercising the whole-batch-in-one-step path (grid=(1,)).
    out2 = fire_forward(x[:2], wsq, bsq, we1, be1, we3, be3)
    out2 = jax.block_until_ready(out2)
    ref2 = fire_reference(x[:2], wsq, bsq, we1, be1, we3, be3)
    assert jnp.allclose(out2, ref2, rtol=5e-2, atol=5e-2), (
        float(jnp.max(jnp.abs(out2 - ref2))))

    print("KERNEL_OK")
</pallas_src>

<mosaic_0001>
module attributes {stable_mosaic.version = 11 : i64} {
  func.func @fire_kernel(%arg0: i32, %arg1: memref<2x4x256xf32, #tpu.memory_space<vmem>>, %arg2: memref<8x4xbf16, #tpu.memory_space<vmem>>, %arg3: memref<16x72xbf16, #tpu.memory_space<vmem>>, %arg4: memref<24x1xf32, #tpu.memory_space<vmem>>, %arg5: memref<2x16x256xf32, #tpu.memory_space<vmem>>, %arg6: memref<72x256xf32, #tpu.memory_space<vmem>>) attributes {dimension_semantics = [#tpu.dimension_semantics<parallel>], iteration_bounds = array<i64: 2>, scalar_prefetch = 0 : i64, scratch_operands = 1 : i64, tpu.core_type = #tpu.core_type<tc>, window_params = [{transform_indices = @transform_0, window_bounds = array<i64: 2, 4, 256>}, {pipeline_mode = #tpu.pipeline_mode<synchronous>, transform_indices = @transform_1, window_bounds = array<i64: 8, 4>}, {pipeline_mode = #tpu.pipeline_mode<synchronous>, transform_indices = @transform_2, window_bounds = array<i64: 16, 72>}, {pipeline_mode = #tpu.pipeline_mode<synchronous>, transform_indices = @transform_3, window_bounds = array<i64: 24, 1>}, {transform_indices = @transform_4, window_bounds = array<i64: 2, 16, 256>}]} {
    %c0 = arith.constant 0 : index
    %c0_0 = arith.constant 0 : index
    %0 = vector.load %arg4[%c0, %c0_0] : memref<24x1xf32, #tpu.memory_space<vmem>>, vector<8x1xf32>
    %c8 = arith.constant 8 : index
    %c0_1 = arith.constant 0 : index
    %1 = vector.load %arg4[%c8, %c0_1] : memref<24x1xf32, #tpu.memory_space<vmem>>, vector<16x1xf32>
    %2 = tpu.iota {dimensions = array<i32: 1>} : vector<1x256xi32>
    %c16_i32 = arith.constant 16 : i32
    %c0_i32 = arith.constant 0 : i32
    %3 = arith.cmpi eq, %c16_i32, %c0_i32 : i32
    %c1_i32 = arith.constant 1 : i32
    %4 = arith.select %3, %c1_i32, %c16_i32 : i32
    %5 = vector.broadcast %4 : i32 to vector<1x256xi32>
    %6 = arith.remsi %2, %5 : vector<1x256xi32>
    %c0_i32_2 = arith.constant 0 : i32
    %7 = vector.broadcast %c0_i32_2 : i32 to vector<1x256xi32>
    %8 = arith.cmpi ne, %6, %7 : vector<1x256xi32>
    %c0_i32_3 = arith.constant 0 : i32
    %9 = vector.broadcast %c0_i32_3 : i32 to vector<1x256xi32>
    %10 = arith.cmpi slt, %6, %9 : vector<1x256xi32>
    %c0_i32_4 = arith.constant 0 : i32
    %11 = arith.cmpi slt, %4, %c0_i32_4 : i32
    %12 = vector.broadcast %11 : i1 to vector<1x256xi1>
    %13 = vector.broadcast %12 : vector<1x256xi1> to vector<1x256xi1>
    %14 = arith.xori %10, %13 : vector<1x256xi1>
    %15 = arith.andi %14, %8 : vector<1x256xi1>
    %16 = vector.broadcast %4 : i32 to vector<1x256xi32>
    %17 = arith.addi %6, %16 : vector<1x256xi32>
    %18 = arith.select %15, %17, %6 : vector<1x256xi1>, vector<1x256xi32>
    %c1_i32_5 = arith.constant 1 : i32
    %19 = vector.broadcast %c1_i32_5 : i32 to vector<1x256xi32>
    %20 = arith.cmpi sge, %18, %19 : vector<1x256xi32>
    %c14_i32 = arith.constant 14 : i32
    %21 = vector.broadcast %c14_i32 : i32 to vector<1x256xi32>
    %22 = arith.cmpi sle, %18, %21 : vector<1x256xi32>
    %c16_i32_6 = arith.constant 16 : i32
    %23 = vector.broadcast %c16_i32_6 : i32 to vector<1x256xi32>
    %24 = arith.cmpi sge, %2, %23 : vector<1x256xi32>
    %c240_i32 = arith.constant 240 : i32
    %25 = vector.broadcast %c240_i32 : i32 to vector<1x256xi32>
    %26 = arith.cmpi slt, %2, %25 : vector<1x256xi32>
    %27 = arith.andi %24, %20 : vector<1x256xi1>
    %28 = arith.andi %24, %22 : vector<1x256xi1>
    %29 = arith.andi %26, %20 : vector<1x256xi1>
    %30 = arith.andi %26, %22 : vector<1x256xi1>
    %c0_i32_7 = arith.constant 0 : i32
    %31 = arith.index_cast %c0_i32_7 : i32 to index
    %c0_8 = arith.constant 0 : index
    %c0_9 = arith.constant 0 : index
    %32 = vector.load %arg1[%31, %c0_8, %c0_9] : memref<2x4x256xf32, #tpu.memory_space<vmem>>, vector<1x4x256xf32>
    %33 = vector.shape_cast %32 : vector<1x4x256xf32> to vector<4x256xf32>
    %34 = arith.truncf %33 : vector<4x256xf32> to vector<4x256xbf16>
    %c0_10 = arith.constant 0 : index
    %c0_11 = arith.constant 0 : index
    %35 = vector.load %arg2[%c0_10, %c0_11] : memref<8x4xbf16, #tpu.memory_space<vmem>>, vector<8x4xbf16>
    %cst = arith.constant dense<0.000000e+00> : vector<8x256xf32>
    %36 = tpu.matmul %35, %34, %cst {dimension_numbers = #tpu.dot_dimension_numbers<[1], [0], [0], [1], [0, 0, 1, 1], [], []>} : vector<8x4xbf16>, vector<4x256xbf16>, vector<8x256xf32> -> vector<8x256xf32>
    %37 = vector.broadcast %0 : vector<8x1xf32> to vector<8x256xf32>
    %38 = arith.addf %36, %37 : vector<8x256xf32>
    %cst_12 = arith.constant 0.000000e+00 : f32
    %39 = vector.broadcast %cst_12 : f32 to vector<8x256xf32>
    %40 = arith.maximumf %38, %39 : vector<8x256xf32>
    %c17_i32 = arith.constant 17 : i32
    %41 = tpu.dynamic_rotate %40 by %c17_i32 dim 1 : vector<8x256xf32>, i32 -> vector<8x256xf32>
    %cst_13 = arith.constant 0.000000e+00 : f32
    %42 = vector.shape_cast %27 : vector<1x256xi1> to vector<1x256xi1>
    %43 = vector.broadcast %42 : vector<1x256xi1> to vector<8x256xi1>
    %44 = vector.broadcast %cst_13 : f32 to vector<8x256xf32>
    %45 = arith.select %43, %41, %44 : vector<8x256xi1>, vector<8x256xf32>
    %c0_14 = arith.constant 0 : index
    %c0_15 = arith.constant 0 : index
    %46 = vector.load %arg6[%c0_14, %c0_15] : memref<72x256xf32, #tpu.memory_space<vmem>>, vector<8x256xf32>
    tpu.vector_store %arg6[%c0_14, %c0_15], %45 {strides = array<i32>} : memref<72x256xf32, #tpu.memory_space<vmem>>, vector<8x256xf32>,
    %c16_i32_16 = arith.constant 16 : i32
    %47 = tpu.dynamic_rotate %40 by %c16_i32_16 dim 1 : vector<8x256xf32>, i32 -> vector<8x256xf32>
    %cst_17 = arith.constant 0.000000e+00 : f32
    %48 = vector.shape_cast %24 : vector<1x256xi1> to vector<1x256xi1>
    %49 = vector.broadcast %48 : vector<1x256xi1> to vector<8x256xi1>
    %50 = vector.broadcast %cst_17 : f32 to vector<8x256xf32>
    %51 = arith.select %49, %47, %50 : vector<8x256xi1>, vector<8x256xf32>
    %c8_18 = arith.constant 8 : index
    %c0_19 = arith.constant 0 : index
    %52 = vector.load %arg6[%c8_18, %c0_19] : memref<72x256xf32, #tpu.memory_space<vmem>>, vector<8x256xf32>
    tpu.vector_store %arg6[%c8_18, %c0_19], %51 {strides = array<i32>} : memref<72x256xf32, #tpu.memory_space<vmem>>, vector<8x256xf32>,
    %c15_i32 = arith.constant 15 : i32
    %53 = tpu.dynamic_rotate %40 by %c15_i32 dim 1 : vector<8x256xf32>, i32 -> vector<8x256xf32>
    %cst_20 = arith.constant 0.000000e+00 : f32
    %54 = vector.shape_cast %28 : vector<1x256xi1> to vector<1x256xi1>
    %55 = vector.broadcast %54 : vector<1x256xi1> to vector<8x256xi1>
    %56 = vector.broadcast %cst_20 : f32 to vector<8x256xf32>
    %57 = arith.select %55, %53, %56 : vector<8x256xi1>, vector<8x256xf32>
    %c16 = arith.constant 16 : index
    %c0_21 = arith.constant 0 : index
    %58 = vector.load %arg6[%c16, %c0_21] : memref<72x256xf32, #tpu.memory_space<vmem>>, vector<8x256xf32>
    tpu.vector_store %arg6[%c16, %c0_21], %57 {strides = array<i32>} : memref<72x256xf32, #tpu.memory_space<vmem>>, vector<8x256xf32>,
    %c1_i32_22 = arith.constant 1 : i32
    %59 = tpu.dynamic_rotate %40 by %c1_i32_22 dim 1 : vector<8x256xf32>, i32 -> vector<8x256xf32>
    %cst_23 = arith.constant 0.000000e+00 : f32
    %60 = vector.shape_cast %20 : vector<1x256xi1> to vector<1x256xi1>
    %61 = vector.broadcast %60 : vector<1x256xi1> to vector<8x256xi1>
    %62 = vector.broadcast %cst_23 : f32 to vector<8x256xf32>
    %63 = arith.select %61, %59, %62 : vector<8x256xi1>, vector<8x256xf32>
    %c24 = arith.constant 24 : index
    %c0_24 = arith.constant 0 : index
    %64 = vector.load %arg6[%c24, %c0_24] : memref<72x256xf32, #tpu.memory_space<vmem>>, vector<8x256xf32>
    tpu.vector_store %arg6[%c24, %c0_24], %63 {strides = array<i32>} : memref<72x256xf32, #tpu.memory_space<vmem>>, vector<8x256xf32>,
    %c32 = arith.constant 32 : index
    %c0_25 = arith.constant 0 : index
    %65 = vector.load %arg6[%c32, %c0_25] : memref<72x256xf32, #tpu.memory_space<vmem>>, vector<8x256xf32>
    tpu.vector_store %arg6[%c32, %c0_25], %40 {strides = array<i32>} : memref<72x256xf32, #tpu.memory_space<vmem>>, vector<8x256xf32>,
    %c255_i32 = arith.constant 255 : i32
    %66 = tpu.dynamic_rotate %40 by %c255_i32 dim 1 : vector<8x256xf32>, i32 -> vector<8x256xf32>
    %cst_26 = arith.constant 0.000000e+00 : f32
    %67 = vector.shape_cast %22 : vector<1x256xi1> to vector<1x256xi1>
    %68 = vector.broadcast %67 : vector<1x256xi1> to vector<8x256xi1>
    %69 = vector.broadcast %cst_26 : f32 to vector<8x256xf32>
    %70 = arith.select %68, %66, %69 : vector<8x256xi1>, vector<8x256xf32>
    %c40 = arith.constant 40 : index
    %c0_27 = arith.constant 0 : index
    %71 = vector.load %arg6[%c40, %c0_27] : memref<72x256xf32, #tpu.memory_space<vmem>>, vector<8x256xf32>
    tpu.vector_store %arg6[%c40, %c0_27], %70 {strides = array<i32>} : memref<72x256xf32, #tpu.memory_space<vmem>>, vector<8x256xf32>,
    %c241_i32 = arith.constant 241 : i32
    %72 = tpu.dynamic_rotate %40 by %c241_i32 dim 1 : vector<8x256xf32>, i32 -> vector<8x256xf32>
    %cst_28 = arith.constant 0.000000e+00 : f32
    %73 = vector.shape_cast %29 : vector<1x256xi1> to vector<1x256xi1>
    %74 = vector.broadcast %73 : vector<1x256xi1> to vector<8x256xi1>
    %75 = vector.broadcast %cst_28 : f32 to vector<8x256xf32>
    %76 = arith.select %74, %72, %75 : vector<8x256xi1>, vector<8x256xf32>
    %c48 = arith.constant 48 : index
    %c0_29 = arith.constant 0 : index
    %77 = vector.load %arg6[%c48, %c0_29] : memref<72x256xf32, #tpu.memory_space<vmem>>, vector<8x256xf32>
    tpu.vector_store %arg6[%c48, %c0_29], %76 {strides = array<i32>} : memref<72x256xf32, #tpu.memory_space<vmem>>, vector<8x256xf32>,
    %c240_i32_30 = arith.constant 240 : i32
    %78 = tpu.dynamic_rotate %40 by %c240_i32_30 dim 1 : vector<8x256xf32>, i32 -> vector<8x256xf32>
    %cst_31 = arith.constant 0.000000e+00 : f32
    %79 = vector.shape_cast %26 : vector<1x256xi1> to vector<1x256xi1>
    %80 = vector.broadcast %79 : vector<1x256xi1> to vector<8x256xi1>
    %81 = vector.broadcast %cst_31 : f32 to vector<8x256xf32>
    %82 = arith.select %80, %78, %81 : vector<8x256xi1>, vector<8x256xf32>
    %c56 = arith.constant 56 : index
    %c0_32 = arith.constant 0 : index
    %83 = vector.load %arg6[%c56, %c0_32] : memref<72x256xf32, #tpu.memory_space<vmem>>, vector<8x256xf32>
    tpu.vector_store %arg6[%c56, %c0_32], %82 {strides = array<i32>} : memref<72x256xf32, #tpu.memory_space<vmem>>, vector<8x256xf32>,
    %c239_i32 = arith.constant 239 : i32
    %84 = tpu.dynamic_rotate %40 by %c239_i32 dim 1 : vector<8x256xf32>, i32 -> vector<8x256xf32>
    %cst_33 = arith.constant 0.000000e+00 : f32
    %85 = vector.shape_cast %30 : vector<1x256xi1> to vector<1x256xi1>
    %86 = vector.broadcast %85 : vector<1x256xi1> to vector<8x256xi1>
    %87 = vector.broadcast %cst_33 : f32 to vector<8x256xf32>
    %88 = arith.select %86, %84, %87 : vector<8x256xi1>, vector<8x256xf32>
    %c64 = arith.constant 64 : index
    %c0_34 = arith.constant 0 : index
    %89 = vector.load %arg6[%c64, %c0_34] : memref<72x256xf32, #tpu.memory_space<vmem>>, vector<8x256xf32>
    tpu.vector_store %arg6[%c64, %c0_34], %88 {strides = array<i32>} : memref<72x256xf32, #tpu.memory_space<vmem>>, vector<8x256xf32>,
    %c0_35 = arith.constant 0 : index
    %c0_36 = arith.constant 0 : index
    %90 = vector.load %arg3[%c0_35, %c0_36] : memref<16x72xbf16, #tpu.memory_space<vmem>>, vector<16x72xbf16>
    %c0_37 = arith.constant 0 : index
    %c0_38 = arith.constant 0 : index
    %91 = vector.load %arg6[%c0_37, %c0_38] : memref<72x256xf32, #tpu.memory_space<vmem>>, vector<72x256xf32>
    %92 = arith.truncf %91 : vector<72x256xf32> to vector<72x256xbf16>
    %cst_39 = arith.constant dense<0.000000e+00> : vector<16x256xf32>
    %93 = tpu.matmul %90, %92, %cst_39 {dimension_numbers = #tpu.dot_dimension_numbers<[1], [0], [0], [1], [0, 0, 1, 1], [], []>} : vector<16x72xbf16>, vector<72x256xbf16>, vector<16x256xf32> -> vector<16x256xf32>
    %94 = vector.broadcast %1 : vector<16x1xf32> to vector<16x256xf32>
    %95 = arith.addf %93, %94 : vector<16x256xf32>
    %cst_40 = arith.constant 0.000000e+00 : f32
    %96 = vector.broadcast %cst_40 : f32 to vector<16x256xf32>
    %97 = arith.maximumf %95, %96 : vector<16x256xf32>
    %98 = arith.index_cast %c0_i32_7 : i32 to index
    %c0_41 = arith.constant 0 : index
    %c0_42 = arith.constant 0 : index
    %99 = vector.load %arg5[%98, %c0_41, %c0_42] : memref<2x16x256xf32, #tpu.memory_space<vmem>>, vector<1x16x256xf32>
    %100 = vector.shape_cast %99 : vector<1x16x256xf32> to vector<16x256xf32>
    %101 = vector.shape_cast %97 : vector<16x256xf32> to vector<1x16x256xf32>
    tpu.vector_store %arg5[%98, %c0_41, %c0_42], %101 {strides = array<i32>} : memref<2x16x256xf32, #tpu.memory_space<vmem>>, vector<1x16x256xf32>,
    %c1_i32_43 = arith.constant 1 : i32
    %102 = arith.index_cast %c1_i32_43 : i32 to index
    %c0_44 = arith.constant 0 : index
    %c0_45 = arith.constant 0 : index
    %103 = vector.load %arg1[%102, %c0_44, %c0_45] : memref<2x4x256xf32, #tpu.memory_space<vmem>>, vector<1x4x256xf32>
    %104 = vector.shape_cast %103 : vector<1x4x256xf32> to vector<4x256xf32>
    %105 = arith.truncf %104 : vector<4x256xf32> to vector<4x256xbf16>
    %c0_46 = arith.constant 0 : index
    %c0_47 = arith.constant 0 : index
    %106 = vector.load %arg2[%c0_46, %c0_47] : memref<8x4xbf16, #tpu.memory_space<vmem>>, vector<8x4xbf16>
    %cst_48 = arith.constant dense<0.000000e+00> : vector<8x256xf32>
    %107 = tpu.matmul %106, %105, %cst_48 {dimension_numbers = #tpu.dot_dimension_numbers<[1], [0], [0], [1], [0, 0, 1, 1], [], []>} : vector<8x4xbf16>, vector<4x256xbf16>, vector<8x256xf32> -> vector<8x256xf32>
    %108 = vector.broadcast %0 : vector<8x1xf32> to vector<8x256xf32>
    %109 = arith.addf %107, %108 : vector<8x256xf32>
    %cst_49 = arith.constant 0.000000e+00 : f32
    %110 = vector.broadcast %cst_49 : f32 to vector<8x256xf32>
    %111 = arith.maximumf %109, %110 : vector<8x256xf32>
    %c17_i32_50 = arith.constant 17 : i32
    %112 = tpu.dynamic_rotate %111 by %c17_i32_50 dim 1 : vector<8x256xf32>, i32 -> vector<8x256xf32>
    %cst_51 = arith.constant 0.000000e+00 : f32
    %113 = vector.shape_cast %27 : vector<1x256xi1> to vector<1x256xi1>
    %114 = vector.broadcast %113 : vector<1x256xi1> to vector<8x256xi1>
    %115 = vector.broadcast %cst_51 : f32 to vector<8x256xf32>
    %116 = arith.select %114, %112, %115 : vector<8x256xi1>, vector<8x256xf32>
    %c0_52 = arith.constant 0 : index
    %c0_53 = arith.constant 0 : index
    %117 = vector.load %arg6[%c0_52, %c0_53] : memref<72x256xf32, #tpu.memory_space<vmem>>, vector<8x256xf32>
    tpu.vector_store %arg6[%c0_52, %c0_53], %116 {strides = array<i32>} : memref<72x256xf32, #tpu.memory_space<vmem>>, vector<8x256xf32>,
    %c16_i32_54 = arith.constant 16 : i32
    %118 = tpu.dynamic_rotate %111 by %c16_i32_54 dim 1 : vector<8x256xf32>, i32 -> vector<8x256xf32>
    %cst_55 = arith.constant 0.000000e+00 : f32
    %119 = vector.shape_cast %24 : vector<1x256xi1> to vector<1x256xi1>
    %120 = vector.broadcast %119 : vector<1x256xi1> to vector<8x256xi1>
    %121 = vector.broadcast %cst_55 : f32 to vector<8x256xf32>
    %122 = arith.select %120, %118, %121 : vector<8x256xi1>, vector<8x256xf32>
    %c8_56 = arith.constant 8 : index
    %c0_57 = arith.constant 0 : index
    %123 = vector.load %arg6[%c8_56, %c0_57] : memref<72x256xf32, #tpu.memory_space<vmem>>, vector<8x256xf32>
    tpu.vector_store %arg6[%c8_56, %c0_57], %122 {strides = array<i32>} : memref<72x256xf32, #tpu.memory_space<vmem>>, vector<8x256xf32>,
    %c15_i32_58 = arith.constant 15 : i32
    %124 = tpu.dynamic_rotate %111 by %c15_i32_58 dim 1 : vector<8x256xf32>, i32 -> vector<8x256xf32>
    %cst_59 = arith.constant 0.000000e+00 : f32
    %125 = vector.shape_cast %28 : vector<1x256xi1> to vector<1x256xi1>
    %126 = vector.broadcast %125 : vector<1x256xi1> to vector<8x256xi1>
    %127 = vector.broadcast %cst_59 : f32 to vector<8x256xf32>
    %128 = arith.select %126, %124, %127 : vector<8x256xi1>, vector<8x256xf32>
    %c16_60 = arith.constant 16 : index
    %c0_61 = arith.constant 0 : index
    %129 = vector.load %arg6[%c16_60, %c0_61] : memref<72x256xf32, #tpu.memory_space<vmem>>, vector<8x256xf32>
    tpu.vector_store %arg6[%c16_60, %c0_61], %128 {strides = array<i32>} : memref<72x256xf32, #tpu.memory_space<vmem>>, vector<8x256xf32>,
    %c1_i32_62 = arith.constant 1 : i32
    %130 = tpu.dynamic_rotate %111 by %c1_i32_62 dim 1 : vector<8x256xf32>, i32 -> vector<8x256xf32>
    %cst_63 = arith.constant 0.000000e+00 : f32
    %131 = vector.shape_cast %20 : vector<1x256xi1> to vector<1x256xi1>
    %132 = vector.broadcast %131 : vector<1x256xi1> to vector<8x256xi1>
    %133 = vector.broadcast %cst_63 : f32 to vector<8x256xf32>
    %134 = arith.select %132, %130, %133 : vector<8x256xi1>, vector<8x256xf32>
    %c24_64 = arith.constant 24 : index
    %c0_65 = arith.constant 0 : index
    %135 = vector.load %arg6[%c24_64, %c0_65] : memref<72x256xf32, #tpu.memory_space<vmem>>, vector<8x256xf32>
    tpu.vector_store %arg6[%c24_64, %c0_65], %134 {strides = array<i32>} : memref<72x256xf32, #tpu.memory_space<vmem>>, vector<8x256xf32>,
    %c32_66 = arith.constant 32 : index
    %c0_67 = arith.constant 0 : index
    %136 = vector.load %arg6[%c32_66, %c0_67] : memref<72x256xf32, #tpu.memory_space<vmem>>, vector<8x256xf32>
    tpu.vector_store %arg6[%c32_66, %c0_67], %111 {strides = array<i32>} : memref<72x256xf32, #tpu.memory_space<vmem>>, vector<8x256xf32>,
    %c255_i32_68 = arith.constant 255 : i32
    %137 = tpu.dynamic_rotate %111 by %c255_i32_68 dim 1 : vector<8x256xf32>, i32 -> vector<8x256xf32>
    %cst_69 = arith.constant 0.000000e+00 : f32
    %138 = vector.shape_cast %22 : vector<1x256xi1> to vector<1x256xi1>
    %139 = vector.broadcast %138 : vector<1x256xi1> to vector<8x256xi1>
    %140 = vector.broadcast %cst_69 : f32 to vector<8x256xf32>
    %141 = arith.select %139, %137, %140 : vector<8x256xi1>, vector<8x256xf32>
    %c40_70 = arith.constant 40 : index
    %c0_71 = arith.constant 0 : index
    %142 = vector.load %arg6[%c40_70, %c0_71] : memref<72x256xf32, #tpu.memory_space<vmem>>, vector<8x256xf32>
    tpu.vector_store %arg6[%c40_70, %c0_71], %141 {strides = array<i32>} : memref<72x256xf32, #tpu.memory_space<vmem>>, vector<8x256xf32>,
    %c241_i32_72 = arith.constant 241 : i32
    %143 = tpu.dynamic_rotate %111 by %c241_i32_72 dim 1 : vector<8x256xf32>, i32 -> vector<8x256xf32>
    %cst_73 = arith.constant 0.000000e+00 : f32
    %144 = vector.shape_cast %29 : vector<1x256xi1> to vector<1x256xi1>
    %145 = vector.broadcast %144 : vector<1x256xi1> to vector<8x256xi1>
    %146 = vector.broadcast %cst_73 : f32 to vector<8x256xf32>
    %147 = arith.select %145, %143, %146 : vector<8x256xi1>, vector<8x256xf32>
    %c48_74 = arith.constant 48 : index
    %c0_75 = arith.constant 0 : index
    %148 = vector.load %arg6[%c48_74, %c0_75] : memref<72x256xf32, #tpu.memory_space<vmem>>, vector<8x256xf32>
    tpu.vector_store %arg6[%c48_74, %c0_75], %147 {strides = array<i32>} : memref<72x256xf32, #tpu.memory_space<vmem>>, vector<8x256xf32>,
    %c240_i32_76 = arith.constant 240 : i32
    %149 = tpu.dynamic_rotate %111 by %c240_i32_76 dim 1 : vector<8x256xf32>, i32 -> vector<8x256xf32>
    %cst_77 = arith.constant 0.000000e+00 : f32
    %150 = vector.shape_cast %26 : vector<1x256xi1> to vector<1x256xi1>
    %151 = vector.broadcast %150 : vector<1x256xi1> to vector<8x256xi1>
    %152 = vector.broadcast %cst_77 : f32 to vector<8x256xf32>
    %153 = arith.select %151, %149, %152 : vector<8x256xi1>, vector<8x256xf32>
    %c56_78 = arith.constant 56 : index
    %c0_79 = arith.constant 0 : index
    %154 = vector.load %arg6[%c56_78, %c0_79] : memref<72x256xf32, #tpu.memory_space<vmem>>, vector<8x256xf32>
    tpu.vector_store %arg6[%c56_78, %c0_79], %153 {strides = array<i32>} : memref<72x256xf32, #tpu.memory_space<vmem>>, vector<8x256xf32>,
    %c239_i32_80 = arith.constant 239 : i32
    %155 = tpu.dynamic_rotate %111 by %c239_i32_80 dim 1 : vector<8x256xf32>, i32 -> vector<8x256xf32>
    %cst_81 = arith.constant 0.000000e+00 : f32
    %156 = vector.shape_cast %30 : vector<1x256xi1> to vector<1x256xi1>
    %157 = vector.broadcast %156 : vector<1x256xi1> to vector<8x256xi1>
    %158 = vector.broadcast %cst_81 : f32 to vector<8x256xf32>
    %159 = arith.select %157, %155, %158 : vector<8x256xi1>, vector<8x256xf32>
    %c64_82 = arith.constant 64 : index
    %c0_83 = arith.constant 0 : index
    %160 = vector.load %arg6[%c64_82, %c0_83] : memref<72x256xf32, #tpu.memory_space<vmem>>, vector<8x256xf32>
    tpu.vector_store %arg6[%c64_82, %c0_83], %159 {strides = array<i32>} : memref<72x256xf32, #tpu.memory_space<vmem>>, vector<8x256xf32>,
    %c0_84 = arith.constant 0 : index
    %c0_85 = arith.constant 0 : index
    %161 = vector.load %arg3[%c0_84, %c0_85] : memref<16x72xbf16, #tpu.memory_space<vmem>>, vector<16x72xbf16>
    %c0_86 = arith.constant 0 : index
    %c0_87 = arith.constant 0 : index
    %162 = vector.load %arg6[%c0_86, %c0_87] : memref<72x256xf32, #tpu.memory_space<vmem>>, vector<72x256xf32>
    %163 = arith.truncf %162 : vector<72x256xf32> to vector<72x256xbf16>
    %cst_88 = arith.constant dense<0.000000e+00> : vector<16x256xf32>
    %164 = tpu.matmul %161, %163, %cst_88 {dimension_numbers = #tpu.dot_dimension_numbers<[1], [0], [0], [1], [0, 0, 1, 1], [], []>} : vector<16x72xbf16>, vector<72x256xbf16>, vector<16x256xf32> -> vector<16x256xf32>
    %165 = vector.broadcast %1 : vector<16x1xf32> to vector<16x256xf32>
    %166 = arith.addf %164, %165 : vector<16x256xf32>
    %cst_89 = arith.constant 0.000000e+00 : f32
    %167 = vector.broadcast %cst_89 : f32 to vector<16x256xf32>
    %168 = arith.maximumf %166, %167 : vector<16x256xf32>
    %169 = arith.index_cast %c1_i32_43 : i32 to index
    %c0_90 = arith.constant 0 : index
    %c0_91 = arith.constant 0 : index
    %170 = vector.load %arg5[%169, %c0_90, %c0_91] : memref<2x16x256xf32, #tpu.memory_space<vmem>>, vector<1x16x256xf32>
    %171 = vector.shape_cast %170 : vector<1x16x256xf32> to vector<16x256xf32>
    %172 = vector.shape_cast %168 : vector<16x256xf32> to vector<1x16x256xf32>
    tpu.vector_store %arg5[%169, %c0_90, %c0_91], %172 {strides = array<i32>} : memref<2x16x256xf32, #tpu.memory_space<vmem>>, vector<1x16x256xf32>,
    %c2_i32 = arith.constant 2 : i32
    return
  }
  func.func @transform_0(%arg0: i32) -> (i32, i32, i32) {
    %c0_i32 = arith.constant 0 : i32
    %c0_i32_0 = arith.constant 0 : i32
    %c0_i32_1 = arith.constant 0 : i32
    return %arg0, %c0_i32, %c0_i32_0 : i32, i32, i32
  }
  func.func @transform_1(%arg0: i32) -> (i32, i32) {
    %c0_i32 = arith.constant 0 : i32
    %c0_i32_0 = arith.constant 0 : i32
    %c0_i32_1 = arith.constant 0 : i32
    return %c0_i32, %c0_i32_0 : i32, i32
  }
  func.func @transform_2(%arg0: i32) -> (i32, i32) {
    %c0_i32 = arith.constant 0 : i32
    %c0_i32_0 = arith.constant 0 : i32
    %c0_i32_1 = arith.constant 0 : i32
    return %c0_i32, %c0_i32_0 : i32, i32
  }
  func.func @transform_3(%arg0: i32) -> (i32, i32) {
    %c0_i32 = arith.constant 0 : i32
    %c0_i32_0 = arith.constant 0 : i32
    %c0_i32_1 = arith.constant 0 : i32
    return %c0_i32, %c0_i32_0 : i32, i32
  }
  func.func @transform_4(%arg0: i32) -> (i32, i32, i32) {
    %c0_i32 = arith.constant 0 : i32
    %c0_i32_0 = arith.constant 0 : i32
    %c0_i32_1 = arith.constant 0 : i32
    return %arg0, %c0_i32, %c0_i32_0 : i32, i32, i32
  }
}

</mosaic_0001>

<bundles_post_ra>
// kernel: fire_forward.1
= control target key start
LH: loop header
LB: loop body
LE: loop exit
PB: predicated region body
PF: predicated region fallthrough
CT: control target
= control target key end

     0   :  { %s1069_s15 = smov 0   ;;  %s1340_s0 = inlined_call_operand.vmem [shape: f32[4,4,256], index: 0, kind: input, shape index: {}]   ;;  %s1341_s1 = inlined_call_operand.vmem [shape: bf16[8,4], index: 1, kind: input, shape index: {}]   ;;  %s1342_s2 = inlined_call_operand.vmem [shape: bf16[16,72], index: 2, kind: input, shape index: {}]   ;;  %s1343_s3 = inlined_call_operand.vmem [shape: f32[24,1], index: 3, kind: input, shape index: {}]   ;;  %s1344_s4 = inlined_call_operand.vmem [shape: f32[4,16,256], index: 4, kind: output, shape index: {}]  }
   0x1 LB: > { %s844_s16 = sadd.s32 4294967295, %s1032_s15   ;;  %p848_p0 = scmp.ge.s32.totalorder %s1032_s15, 1  ;;  %s1032_s15 = sphi %s1069_s15, %s14_s15  }
   0x2   : > { %p164_p1 = scmp.lt.s32.totalorder %s1032_s15, 3 }
   0x4   : > { %p165_p2 = pnand %p848_p0, %p164_p1 }
   0x5   : > { %s849_s17 = sshll.u32 (!%p165_p2), %s844_s16, 1  ;;  %v1034_v0 = vmov (!%p165_p2), 0   ;;  %v207_v1 = vld [vmem:[%s1343_s3] sm:$0xff] (!%p165_p2)  ;;  %vm269_vm0 = vcmask (!%p165_p2), 1041408   ;;  %vm265_vm1 = vcmask (!%p165_p2), 31744   ;;  %s1035_s28 = smov (!%p165_p2), 16   ;;  %v210_v35 = vlaneseq (!%p165_p2) }
   0x6   : > { %168 = sbr.rel (%p165_p2) target bundleno = 617 (0x269), region = 36  ;;  %p193_p3 = scmp.lt.s32.totalorder (!%p165_p2), %s849_s17, 3  ;;  %308 = vmatprep.mubr.bf16.mxu1 (!%p165_p2), %v1034_v0  ;;  %597 = vmatprep.mubr.bf16.mxu0 (!%p165_p2), %v1034_v0  ;;  %v259_v12 = vld [vmem:[%s1341_s1] sm:$0xf] (!%p165_p2)  ;;  %v209_v33 = vld [vmem:[%s1343_s3 + $0x10] sm:$0xff] (!%p165_p2)  ;;  %v208_v34 = vld [vmem:[%s1343_s3 + $0x8] sm:$0xff] (!%p165_p2) }
   0x7   : > { %940 = vset.pattern.permute.xlu0 (!%p165_p2), %v1034_v0  ;;  %1021 = vset.pattern.permute.xlu1 (!%p165_p2), %v1034_v0  ;;  %v555_v13 = vld [vmem:[%s1341_s1] sm:$0xf] (!%p165_p2)  ;;  %s1036_s29 = smov (!%p165_p2), 17   ;;  %s1037_s30 = smov (!%p165_p2), 15   ;;  %v1118_v36 = vand.u32 (!%p165_p2), 127, %v210_v35  ;;  %vm1043_vm8 = vmmov (!%p165_p2), 1  }
   0x8   : > { %262 = vperm.xlu0 (!%p165_p2), %940, %v207_v1   ;;  %s1038_s5 = smov (!%p165_p2), 1   ;;  %s1039_s6 = smov (!%p165_p2), 127   ;;  %v1025_v62 = vld [vmem:[%s1342_s2] sm:$0xff] (!%p165_p2)  }
   0x9   : > { %s1040_s7 = smov (!%p165_p2), 113   ;;  %s1041_s8 = smov (!%p165_p2), 112   ;;  %v1121_v37 = vadd.s32 (!%p165_p2), 128, %v1118_v36  ;;  %v217_v38 = vand.u32 (!%p165_p2), 15, %v1118_v36  ;;  %vm241_vm3 = vcmp.ge.s32.totalorder (!%p165_p2), %v1118_v36, 16  ;;  %vm338_vm4 = vcmp.lt.s32.totalorder (!%p165_p2), %v1118_v36, 16 }
   0xa   : > { %s1042_s9 = smov (!%p165_p2), 111   ;;  %vm323_vm5 = vcmp.lt.s32.totalorder (!%p165_p2), %v1118_v36, 17  ;;  %vm353_vm11 = vcmp.lt.s32.totalorder (!%p165_p2), %v1118_v36, 15  ;;  %vm368_vm13 = vcmp.lt.s32.totalorder (!%p165_p2), %v1118_v36, 1 }
   0xb   : > { %v224_v39 = vand.u32 (!%p165_p2), 15, %v1121_v37  ;;  %vm1125_vm2 = vcmp.ge.s32.totalorder (!%p165_p2), %v217_v38, 1  ;;  %vm1164_vm12 = vcmp.le.s32.totalorder (!%p165_p2), %v217_v38, 14 }
   0xc   : > { %vm245_vm7 = vmand (!%p165_p2), %vm241_vm3, %vm1125_vm2 }
   0xd   : > { %s1368_s17 = smov (!%p193_p3, %s849_s17), 3  ;;  %vm1132_vm6 = vcmp.ge.s32.totalorder %v224_v39, 1  ;;  %vm1157_vm10 = vmpackc.low %vm241_vm3, %vm245_vm7  ;;  %vm1179_vm14 = vcmp.le.s32.totalorder %v224_v39, 14  ;;  %vm415_vm7 = vcmp.lt.s32.totalorder %v1118_v36, 112 }
   0xe   : > { %s872_s20 = sshll.u32 %s1368_s17, 3  ;;  %vm1151_vm9 = vmpackc.low %vm1043_vm8, %vm1132_vm6 }
   0xf   : > { %s197_s23 = scalar_lea.vmem %s1340_s0, %s872_s20  ;;  %vm1187_vm15 = vmand %vm241_vm3, %vm1164_vm12  ;;  %vm385_vm3 = vcmp.lt.s32.totalorder %v1118_v36, 127  ;;  %s873_s20 = sshll.u32 %s1368_s17, 5 }
  0x10   : > { %v253_v2 = vld [vmem:[%s197_s23] sm:$0xff]  ;;  %v860_v3 = vld [vmem:[%s197_s23 + $0x8] sm:$0xff]  ;;  %s204_s23 = scalar_lea.vmem %s1344_s4, %s873_s20 }
  0x11   : > { %v255_v4 = vcombine.high %v253_v2, %v253_v2  ;;  %v551_v5 = vcombine.high %v860_v3, %v860_v3  ;;  %v257_v6 = vpack.c.bf16 %v253_v2, %v253_v2  ;;  %v553_v7 = vpack.c.bf16 %v860_v3, %v860_v3 }
  0x13   : > { %v258_v8 = vpack.c.bf16 %v255_v4, %v255_v4  ;;  %v554_v9 = vpack.c.bf16 %v551_v5, %v551_v5  ;;  %v271_v10 = vsel %vm269_vm0, %v257_v6, 0  ;;  %v560_v11 = vsel %vm269_vm0, %v553_v7, 0 }
  0x15   : > { %855 = vmatprep.subr.msk.bf16.mxu1 %vm269_vm0, %v258_v8  ;;  %861 = vmatprep.subr.msk.bf16.mxu0 %vm269_vm0, %v554_v9  ;;  %vm880_vm0 = vmpackc.low %vm1132_vm6, %vm1179_vm14 }
  0x16   : > { %277 = vmatpush1.bf16.msra.mxu1 %v271_v10  ;;  %566 = vmatpush1.bf16.msra.mxu0 %v560_v11 }
  0x19   : > { %856 = vmatmul.mubr.msk.bf16.vlgmr.msra.gmra.mrb[0].mxu1 %vm265_vm1, %v259_v12  ;;  %862 = vmatmul.mubr.msk.bf16.vlgmr.msra.gmra.mrb[0].mxu0 %vm265_vm1, %v555_v13  ;;  %vm883_vm1 = vmpackc.low %vm1125_vm2, %vm1187_vm15  ;;  %vm490_vm15 = vcmask 1043456  }
  0x1a   : > { %529 = vmatprep.mubr.bf16.mxu1 %v1034_v0  ;;  %766 = vmatprep.mubr.bf16.mxu0 %v1034_v0 }
  0x87   : > { %v263_v14 = vpop.permute.xlu0 %262 }
  0xec   : > { %v310_v15 = vpop.f32.mrb[0].mxu1  ;;  %v599_v16 = vpop.f32.mrb[0].mxu0 }
  0xed   : > { %v1092_v17 = vadd.f32 %v310_v15, %v263_v14  ;;  %v312_v18 = vpop.f32.mrb[1].mxu1  ;;  %v601_v19 = vpop.f32.mrb[1].mxu0  ;;  %v1094_v20 = vadd.f32 %v599_v16, %v263_v14 }
  0xee   : > { %v1096_v21 = vadd.f32 %v312_v18, %v263_v14  ;;  %v1098_v22 = vadd.f32 %v601_v19, %v263_v14  ;;  %v314_v23 = vpop.f32.mrb[2].mxu1  ;;  %v603_v24 = vpop.f32.mrb[2].mxu0 }
  0xef   : > { %v317_v25 = vmax.f32 %v1092_v17, 0.0  ;;  %v315_v26 = vpop.f32.mrb[3].mxu1  ;;  %v604_v27 = vpop.f32.mrb[3].mxu0  ;;  %v606_v29 = vmax.f32 %v1094_v20, 0.0 }
  0xf0   : > { %v318_v28 = vmax.f32 %v1096_v21, 0.0  ;;  %v607_v30 = vmax.f32 %v1098_v22, 0.0 }
  0xf2   : > { %v946_v31 = vpack.i.bf16 %v318_v28, %v317_v25  ;;  %v951_v32 = vpack.i.bf16 %v607_v30, %v606_v29 }
  0xf4   : > { %947 = vrot.lane.b32.xlu1 %v946_v31, %s1035_s28  ;;  %942 = vrot.lane.b32.xlu0 %v946_v31, %s1036_s29 }
  0xf8   : > { %952 = vrot.lane.b32.xlu1 %v951_v32, %s1036_s29  ;;  %957 = vrot.lane.b32.xlu0 %v951_v32, %s1035_s28 }
  0xfc   : > { %962 = vrot.lane.b32.xlu1 %v946_v31, %s1037_s30  ;;  %967 = vrot.lane.b32.xlu0 %v946_v31, %s1038_s5 }
 0x100   : > { %972 = vrot.lane.b32.xlu1 %v951_v32, %s1037_s30  ;;  %977 = vrot.lane.b32.xlu0 %v951_v32, %s1038_s5 }
 0x104   : > { %982 = vrot.lane.b32.xlu1 %v946_v31, %s1039_s6  ;;  %987 = vrot.lane.b32.xlu0 %v951_v32, %s1039_s6 }
 0x108   : > { %992 = vrot.lane.b32.xlu1 %v946_v31, %s1040_s7  ;;  %997 = vrot.lane.b32.xlu0 %v946_v31, %s1041_s8 }
 0x10c   : > { %1002 = vrot.lane.b32.xlu1 %v951_v32, %s1040_s7  ;;  %1007 = vrot.lane.b32.xlu0 %v951_v32, %s1041_s8 }
 0x110   : > { %1012 = vrot.lane.b32.xlu1 %v946_v31, %s1042_s9  ;;  %1017 = vrot.lane.b32.xlu0 %v951_v32, %s1042_s9 }
 0x114   : > { %478 = vperm.xlu0 %940, %v209_v33   ;;  %473 = vperm.xlu1 %1021, %v208_v34  }
 0x166   : > { %v948_v41 = vpop.permute.xlu1 %947  ;;  %v943_v42 = vpop.permute.xlu0 %942 }
 0x167   : > { %v950_v44 = vunpack.i.h.bf16 %v948_v41  ;;  %v949_v45 = vunpack.i.l.bf16 %v948_v41  ;;  %v945_v46 = vunpack.i.h.bf16 %v943_v42  ;;  %v944_v47 = vunpack.i.l.bf16 %v943_v42 }
 0x169   : > { %v339_v48 = vsel %vm338_vm4, %v949_v45, %v950_v44  ;;  %v340_v49 = vsel %vm338_vm4, %v950_v44, %v949_v45  ;;  %v324_v50 = vsel %vm323_vm5, %v944_v47, %v945_v46  ;;  %v325_v51 = vsel %vm323_vm5, %v945_v46, %v944_v47 }
 0x16a   : > { %v875_v53 = vpack.c.bf16 %v339_v48, %v324_v50  ;;  %v878_v54 = vpack.c.bf16 %v340_v49, %v325_v51  ;;  %v953_v55 = vpop.permute.xlu1 %952  ;;  %v958_v56 = vpop.permute.xlu0 %957 }
 0x16b   : > { %v955_v58 = vunpack.i.h.bf16 %v953_v55  ;;  %v954_v59 = vunpack.i.l.bf16 %v953_v55  ;;  %v960_v60 = vunpack.i.h.bf16 %v958_v56  ;;  %v959_v61 = vunpack.i.l.bf16 %v958_v56 }
 0x16c   : > { %876 = vmatprep.subr.msk.bf16.mxu1 %vm1151_vm9, %v875_v53 }
 0x16d   : > { %v612_v63 = vsel %vm323_vm5, %v954_v59, %v955_v58  ;;  %v613_v0 = vsel %vm323_vm5, %v955_v58, %v954_v59  ;;  %v622_v1 = vsel %vm338_vm4, %v959_v61, %v960_v60  ;;  %v623_v2 = vsel %vm338_vm4, %v960_v60, %v959_v61  ;;  %879 = vmatpush1.bf16.msk.msra.mxu1 %vm1157_vm10, %v878_v54 }
 0x16e   : > { %v899_v3 = vpack.c.bf16 %v622_v1, %v612_v63  ;;  %v902_v4 = vpack.c.bf16 %v623_v2, %v613_v0  ;;  %v963_v5 = vpop.permute.xlu1 %962  ;;  %v968_v6 = vpop.permute.xlu0 %967  ;;  %vm244_vm4 = vcmp.lt.s32.totalorder %v1121_v37, 240  ;;  %vm400_vm5 = vcmp.lt.s32.totalorder %v1118_v36, 113 }
 0x16f   : > { %v965_v8 = vunpack.i.h.bf16 %v963_v5  ;;  %v964_v9 = vunpack.i.l.bf16 %v963_v5  ;;  %v970_v10 = vunpack.i.h.bf16 %v968_v6  ;;  %v969_v11 = vunpack.i.l.bf16 %v968_v6 }
 0x170   : > { %900 = vmatprep.subr.msk.bf16.mxu0 %vm1151_vm9, %v899_v3  ;;  %vm1241_vm9 = vmpackc.low %vm1179_vm14, %vm1043_vm8 }
 0x171   : > { %v354_v13 = vsel %vm353_vm11, %v964_v9, %v965_v8  ;;  %v355_v14 = vsel %vm353_vm11, %v965_v8, %v964_v9  ;;  %v369_v15 = vsel %vm368_vm13, %v969_v11, %v970_v10  ;;  %v370_v16 = vsel %vm368_vm13, %v970_v10, %v969_v11  ;;  %903 = vmatpush1.bf16.msk.msra.mxu0 %vm1157_vm10, %v902_v4  ;;  %vm1253_vm10 = vmpackc.low %vm1164_vm12, %vm1043_vm8 }
 0x172   : > { %v881_v18 = vpack.c.bf16 %v369_v15, %v354_v13  ;;  %v884_v19 = vpack.c.bf16 %v370_v16, %v355_v14  ;;  %v973_v23 = vpop.permute.xlu1 %972  ;;  %v978_v24 = vpop.permute.xlu0 %977 }
 0x173   : > { %v975_v26 = vunpack.i.h.bf16 %v973_v23  ;;  %v974_v27 = vunpack.i.l.bf16 %v973_v23  ;;  %v980_v31 = vunpack.i.h.bf16 %v978_v24  ;;  %v979_v32 = vunpack.i.l.bf16 %v978_v24 }
 0x174   : > { %882 = vmatprep.subr.msk.bf16.mxu1 %vm880_vm0, %v881_v18 }
 0x175   : > { %v632_v33 = vsel %vm353_vm11, %v974_v27, %v975_v26  ;;  %v633_v34 = vsel %vm353_vm11, %v975_v26, %v974_v27  ;;  %v642_v35 = vsel %vm368_vm13, %v979_v32, %v980_v31  ;;  %v643_v38 = vsel %vm368_vm13, %v980_v31, %v979_v32  ;;  %885 = vmatpush1.bf16.msk.msra.mxu1 %vm883_vm1, %v884_v19  ;;  %vm250_vm11 = vmand %vm244_vm4, %vm1132_vm6 }
 0x176   : > { %v905_v39 = vpack.c.bf16 %v642_v35, %v632_v33  ;;  %v908_v41 = vpack.c.bf16 %v643_v38, %v633_v34  ;;  %v983_v42 = vpop.permute.xlu1 %982  ;;  %v988_v44 = vpop.permute.xlu0 %987  ;;  %vm1285_vm6 = vmpackc.low %vm244_vm4, %vm250_vm11 }
 0x177   : > { %v985_v45 = vunpack.i.h.bf16 %v983_v42  ;;  %v984_v46 = vunpack.i.l.bf16 %v983_v42  ;;  %v990_v47 = vunpack.i.h.bf16 %v988_v44  ;;  %v989_v48 = vunpack.i.l.bf16 %v988_v44  ;;  %vm1294_vm13 = vmpackc.low %vm1043_vm8, %vm1125_vm2 }
 0x178   : > { %906 = vmatprep.subr.msk.bf16.mxu0 %vm880_vm0, %v905_v39  ;;  %vm430_vm2 = vcmp.lt.s32.totalorder %v1118_v36, 111  ;;  %vm252_vm8 = vmand %vm244_vm4, %vm1179_vm14 }
 0x179   : > { %v386_v50 = vsel %vm385_vm3, %v984_v46, %v985_v45  ;;  %v387_v51 = vsel %vm385_vm3, %v985_v45, %v984_v46  ;;  %v654_v52 = vsel %vm385_vm3, %v989_v48, %v990_v47  ;;  %v655_v53 = vsel %vm385_vm3, %v990_v47, %v989_v48  ;;  %909 = vmatpush1.bf16.msk.msra.mxu0 %vm883_vm1, %v908_v41  ;;  %v1024_v41 = vld [vmem:[%s1342_s2] sm:$0xff]  }
 0x17a   : > { %v887_v55 = vpack.c.bf16 %v387_v51, %v318_v28  ;;  %v890_v56 = vpack.c.bf16 %v386_v50, %v317_v25  ;;  %v911_v57 = vpack.c.bf16 %v655_v53, %v607_v30  ;;  %v914_v58 = vpack.c.bf16 %v654_v52, %v606_v29  ;;  %v993_v59 = vpop.permute.xlu1 %992  ;;  %v998_v60 = vpop.permute.xlu0 %997 }
 0x17b   : > { %v995_v61 = vunpack.i.h.bf16 %v993_v59  ;;  %v994_v63 = vunpack.i.l.bf16 %v993_v59  ;;  %v1000_v21 = vunpack.i.h.bf16 %v998_v60  ;;  %v999_v28 = vunpack.i.l.bf16 %v998_v60 }
 0x17c   : > { %888 = vmatprep.subr.msk.bf16.mxu1 %vm1241_vm9, %v887_v55  ;;  %912 = vmatprep.subr.msk.bf16.mxu0 %vm1241_vm9, %v911_v57 }
 0x17d   : > { %v401_v17 = vsel %vm400_vm5, %v994_v63, %v995_v61  ;;  %v402_v20 = vsel %vm400_vm5, %v995_v61, %v994_v63  ;;  %v416_v22 = vsel %vm415_vm7, %v999_v28, %v1000_v21  ;;  %v417_v25 = vsel %vm415_vm7, %v1000_v21, %v999_v28  ;;  %891 = vmatpush1.bf16.msk.msra.mxu1 %vm1253_vm10, %v890_v56 }
 0x17e   : > { %v893_v30 = vpack.c.bf16 %v417_v25, %v402_v20  ;;  %v896_v43 = vpack.c.bf16 %v416_v22, %v401_v17  ;;  %915 = vmatpush1.bf16.msk.msra.mxu0 %vm1253_vm10, %v914_v58  ;;  %v1003_v0 = vpop.permute.xlu1 %1002  ;;  %v1008_v1 = vpop.permute.xlu0 %1007 }
 0x17f   : > { %v1005_v3 = vunpack.i.h.bf16 %v1003_v0  ;;  %v1004_v4 = vunpack.i.l.bf16 %v1003_v0  ;;  %v1010_v5 = vunpack.i.h.bf16 %v1008_v1  ;;  %v1009_v6 = vunpack.i.l.bf16 %v1008_v1 }
 0x180   : > { %894 = vmatprep.subr.msk.bf16.mxu1 %vm1285_vm6, %v893_v30 }
 0x181   : > { %v664_v8 = vsel %vm400_vm5, %v1004_v4, %v1005_v3  ;;  %v665_v9 = vsel %vm400_vm5, %v1005_v3, %v1004_v4  ;;  %v674_v40 = vsel %vm415_vm7, %v1009_v6, %v1010_v5  ;;  %v675_v10 = vsel %vm415_vm7, %v1010_v5, %v1009_v6  ;;  %897 = vmatpush1.bf16.msk.msra.mxu1 %vm1294_vm13, %v896_v43 }
 0x182   : > { %v917_v11 = vpack.c.bf16 %v675_v10, %v665_v9  ;;  %v920_v12 = vpack.c.bf16 %v674_v40, %v664_v8  ;;  %v1013_v13 = vpop.permute.xlu1 %1012  ;;  %v1018_v14 = vpop.permute.xlu0 %1017 }
 0x183   : > { %v1015_v15 = vunpack.i.h.bf16 %v1013_v13  ;;  %v1014_v16 = vunpack.i.l.bf16 %v1013_v13  ;;  %v1020_v18 = vunpack.i.h.bf16 %v1018_v14  ;;  %v1019_v19 = vunpack.i.l.bf16 %v1018_v14 }
 0x184   : > { %918 = vmatprep.subr.msk.bf16.mxu0 %vm1285_vm6, %v917_v11 }
 0x185   : > { %v431_v23 = vsel %vm430_vm2, %v1014_v16, %v1015_v15  ;;  %v432_v24 = vsel %vm430_vm2, %v1015_v15, %v1014_v16  ;;  %v684_v26 = vsel %vm430_vm2, %v1019_v19, %v1020_v18  ;;  %v685_v27 = vsel %vm430_vm2, %v1020_v18, %v1019_v19  ;;  %921 = vmatpush1.bf16.msk.msra.mxu0 %vm1294_vm13, %v920_v12 }
 0x186   : > { %v438_v36 = vsel %vm252_vm8, %v432_v24, 0.0  ;;  %v687_v7 = vsel %vm252_vm8, %v685_v27, 0.0  ;;  %v437_v37 = vsel %vm1164_vm12, %v431_v23, 0.0  ;;  %v686_v31 = vsel %vm1164_vm12, %v684_v26, 0.0 }
 0x187   : > { %v470_v32 = vpack.c.bf16 %v438_v36, %v438_v36  ;;  %v719_v33 = vpack.c.bf16 %v687_v7, %v687_v7  ;;  %v469_v34 = vpack.c.bf16 %v437_v37, %v437_v37  ;;  %v718_v35 = vpack.c.bf16 %v686_v31, %v686_v31 }
 0x188   : > { %vm486_vm12 = vcmask 588800  }
 0x189   : > { %858 = vmatprep.subr.msk.bf16.mxu1 %vm490_vm15, %v470_v32  ;;  %864 = vmatprep.subr.msk.bf16.mxu0 %vm490_vm15, %v719_v33  ;;  %v492_v38 = vsel %vm490_vm15, %v469_v34, 0  ;;  %v729_v39 = vsel %vm490_vm15, %v718_v35, 0 }
 0x18a   : > { %506 = vmatpush1.bf16.msra.mxu1 %v492_v38  ;;  %743 = vmatpush1.bf16.msra.mxu0 %v729_v39 }
 0x18d   : > { %859 = vmatmul.mubr.msk.bf16.vlgmr.msra.gmra.mrb[4].mxu1 %vm486_vm12, %v1024_v41  ;;  %865 = vmatmul.mubr.msk.bf16.vlgmr.msra.gmra.mrb[4].mxu0 %vm486_vm12, %v1025_v62 }
 0x193   : > { %v474_v42 = vpop.permute.xlu1 %473  ;;  %v479_v44 = vpop.permute.xlu0 %478 }
 0x260   : > { %v531_v45 = vpop.f32.mrb[4].mxu1  ;;  %v768_v46 = vpop.f32.mrb[4].mxu0 }
 0x261   : > { %v532_v47 = vadd.f32 %v531_v45, %v474_v42  ;;  %v769_v48 = vadd.f32 %v768_v46, %v474_v42  ;;  %v533_v49 = vpop.f32.mrb[5].mxu1  ;;  %v770_v50 = vpop.f32.mrb[5].mxu0 }
 0x262   : > { %v534_v51 = vadd.f32 %v533_v49, %v474_v42  ;;  %v771_v52 = vadd.f32 %v770_v50, %v474_v42  ;;  %v535_v53 = vpop.f32.mrb[6].mxu1  ;;  %v772_v54 = vpop.f32.mrb[6].mxu0 }
 0x263   : > { %v540_v55 = vmax.f32 %v532_v47, 0.0  ;;  %v777_v56 = vmax.f32 %v769_v48, 0.0  ;;  %v536_v57 = vadd.f32 %v535_v53, %v479_v44  ;;  %v773_v58 = vadd.f32 %v772_v54, %v479_v44  ;;  %v537_v59 = vpop.f32.mrb[7].mxu1  ;;  %v774_v60 = vpop.f32.mrb[7].mxu0 }
 0x264   : > { %v541_v61 = vmax.f32 %v534_v51, 0.0  ;;  %v778_v63 = vmax.f32 %v771_v52, 0.0  ;;  %v538_v21 = vadd.f32 %v537_v59, %v479_v44  ;;  %v775_v28 = vadd.f32 %v774_v60, %v479_v44 }
 0x265   : > { %544 = vst [vmem:[%s204_s23] sm:$0xff] %v540_v55  ;;  %v542_v17 = vmax.f32 %v536_v57, 0.0  ;;  %v779_v20 = vmax.f32 %v773_v58, 0.0  ;;  %866 = vst [vmem:[%s204_s23 + $0x20] sm:$0xff] %v777_v56 }
 0x266   : > { %545 = vst [vmem:[%s204_s23 + $0x8] sm:$0xff] %v541_v61  ;;  %v543_v22 = vmax.f32 %v538_v21, 0.0  ;;  %v780_v25 = vmax.f32 %v775_v28, 0.0  ;;  %867 = vst [vmem:[%s204_s23 + $0x28] sm:$0xff] %v778_v63 }
 0x267   : > { %546 = vst [vmem:[%s204_s23 + $0x10] sm:$0xff] %v542_v17  ;;  %868 = vst [vmem:[%s204_s23 + $0x30] sm:$0xff] %v779_v20 }
 0x268   : > { %547 = vst [vmem:[%s204_s23 + $0x18] sm:$0xff] %v543_v22  ;;  %869 = vst [vmem:[%s204_s23 + $0x38] sm:$0xff] %v780_v25 }
 0x269 PF: > { %s14_s15 = sadd.s32 1, %s1032_s15  }
 0x26a   : > { %p11_p4 = scmp.ge.s32.totalorder %s14_s15, 4  }
 0x26c   :  { %13 = sbr.rel (!%p11_p4) target bundleno = 1 (0x1), region = 68 }

</bundles_post_ra>
